<compile_context>
chip_gen: v6e
topology: v6e:2x2x1
jax: 0.10.0
libtpu: 0.0.40
codegen_flags: <defaults>
</compile_context>

<pallas_src>
import functools

import jax
import jax.numpy as jnp
from jax.experimental import pallas as pl
from jax.experimental.pallas import tpu as pltpu

PAD_IDX = 0  # config.PAD_TOKEN


def _cdiv(a, b):
    return (a + b - 1) // b


def _round_up(a, b):
    return _cdiv(a, b) * b


def _embed_resident_kernel(idx_ref, w_ref, o_ref, *, tq, batch):
    # idx_ref: SMEM (seq_pad*batch,) int32   position-major flattened ids
    # w_ref  : VMEM (vocab, embed)           full table, resident across steps
    # o_ref  : VMEM (tq, batch, embed)       this step's (seq, batch, embed) tile
    q = pl.program_id(0)
    base = q * tq
    vocab = w_ref.shape[0]
    for t in range(tq):                      # static, bounded unroll
        for b in range(batch):
            tok = jnp.clip(idx_ref[(base + t) * batch + b], 0, vocab - 1)
            # Dynamic-sublane VMEM gather straight into the output block.
            o_ref[t, b:b + 1, :] = w_ref[pl.ds(tok, 1), :]


def _embed_hbm_gather_kernel(idx_ref, w_hbm, o_ref, sem, *, tq, batch):
    # w_hbm: HBM (vocab, embed) -- never fully DMA'd; rows land straight in o_ref.
    q = pl.program_id(0)
    base = q * tq
    vocab = w_hbm.shape[0]
    copies = []
    for t in range(tq):                      # static, bounded unroll
        for b in range(batch):
            tok = jnp.clip(idx_ref[(base + t) * batch + b], 0, vocab - 1)
            cp = pltpu.make_async_copy(
                w_hbm.at[pl.ds(tok, 1), :],        # (1, embed) source row
                o_ref.at[t, pl.ds(b, 1), :],       # (1, embed) dest row in output
                sem.at[0],
            )
            cp.start()
            copies.append(cp)
    for cp in copies:                        # all row DMAs are in flight; now drain
        cp.wait()


def embedding_forward(indices, weight, *, rows_per_step=128, force_hbm_gather=False):
    """indices: (batch, seq) int; weight: (vocab, embed_dim) f32.
       Returns (seq, batch, embed_dim) f32, same as EmbeddingLayer.forward."""
    batch, seq_len = indices.shape
    vocab, embed_dim = weight.shape
    itemsize = jnp.dtype(weight.dtype).itemsize

    # Seq-tile size: target `rows_per_step` gathered rows per grid step, but
    # keep >= 2 grid steps when possible so both v7x TensorCores get work.
    tq = max(1, min(rows_per_step // max(batch, 1), seq_len))
    if seq_len >= 2 and _cdiv(seq_len, tq) < 2:
        tq = _cdiv(seq_len, 2)
    seq_pad = _round_up(seq_len, tq)
    n_tiles = seq_pad // tq

    # Flat, position-major ids in SMEM: idx[s * batch + b].
    ids = indices.astype(jnp.int32).T            # (seq, batch)
    if seq_pad != seq_len:
        ids = jnp.pad(ids, ((0, seq_pad - seq_len), (0, 0)),
                      constant_values=PAD_IDX)
    ids_flat = ids.reshape(-1)

    # Conservative VMEM budget for the resident-table fast path (covers double
    # buffering of the table block + output block on every TPU generation).
    table_bytes = vocab * embed_dim * itemsize
    out_block_bytes = tq * _round_up(batch, 8) * _round_up(embed_dim, 128) * itemsize
    resident_ok = (2 * table_bytes + 2 * out_block_bytes + (2 << 20)) <= (12 << 20)

    out_spec = pl.BlockSpec((tq, batch, embed_dim), lambda q, idx: (q, 0, 0))
    out_shape = jax.ShapeDtypeStruct((seq_pad, batch, embed_dim), weight.dtype)

    if resident_ok and not force_hbm_gather:
        grid_spec = pltpu.PrefetchScalarGridSpec(
            num_scalar_prefetch=1,                 # token ids -> SMEM
            grid=(n_tiles,),
            in_specs=[
                # Full table, constant block index -> DMA'd once, stays resident.
                pl.BlockSpec((vocab, embed_dim), lambda q, idx: (0, 0)),
            ],
            out_specs=out_spec,
        )
        kernel = functools.partial(_embed_resident_kernel, tq=tq, batch=batch)
    else:
        grid_spec = pltpu.PrefetchScalarGridSpec(
            num_scalar_prefetch=1,                 # token ids -> SMEM
            grid=(n_tiles,),
            in_specs=[
                pl.BlockSpec(memory_space=pl.ANY),  # table stays in HBM
            ],
            out_specs=out_spec,
            scratch_shapes=[pltpu.SemaphoreType.DMA((1,))],
        )
        kernel = functools.partial(_embed_hbm_gather_kernel, tq=tq, batch=batch)

    out = pl.pallas_call(
        kernel,
        out_shape=out_shape,
        grid_spec=grid_spec,
        compiler_params=pltpu.CompilerParams(dimension_semantics=("parallel",)),
    )(ids_flat, weight)

    # Already (seq, batch, embed); just drop seq padding.
    return out[:seq_len]


if __name__ == "__main__":
    # small, deterministic setup
    vocab_size = 64
    embed_dim = 128
    batch = 2
    seq_len = 8

    key = jax.random.PRNGKey(0)
    k_w, k_idx = jax.random.split(key)

    # Deterministic "GloVe-like" table; padding_idx row zeroed, matching
    # nn.Embedding(padding_idx=pad_idx) forward semantics.
    weight = jax.random.normal(k_w, (vocab_size, embed_dim), dtype=jnp.float32)
    weight = weight.at[PAD_IDX].set(0.0)

    x = jax.random.randint(k_idx, (batch, seq_len), 0, vocab_size, dtype=jnp.int32)
    x = x.at[:, -2:].set(PAD_IDX)   # a few padding tokens

    # reference: embedding lookup + permute(1, 0, 2)
    ref = jnp.transpose(weight[x], (1, 0, 2))

    # Resident-table fast path (table fits VMEM at this size).
    out_resident = jax.block_until_ready(embedding_forward(x, weight))
    assert out_resident.shape == (seq_len, batch, embed_dim)
    assert jnp.allclose(out_resident, ref, atol=1e-6), "resident path mismatch"

    # HBM per-row DMA gather path (used when the table is too big for VMEM).
    out_hbm = jax.block_until_ready(
        embedding_forward(x, weight, force_hbm_gather=True))
    assert out_hbm.shape == (seq_len, batch, embed_dim)
    assert jnp.allclose(out_hbm, ref, atol=1e-6), "HBM gather path mismatch"

    print("KERNEL_OK")
</pallas_src>

<mosaic_0001>
module attributes {stable_mosaic.version = 11 : i64} {
  func.func @_embed_resident_kernel(%arg0: i32, %arg1: memref<16xi32, #tpu.memory_space<smem>>, %arg2: memref<64x128xf32, #tpu.memory_space<vmem>>, %arg3: memref<4x2x128xf32, #tpu.memory_space<vmem>>) attributes {dimension_semantics = [#tpu.dimension_semantics<parallel>], iteration_bounds = array<i64: 2>, scalar_prefetch = 1 : i64, scratch_operands = 0 : i64, tpu.core_type = #tpu.core_type<tc>, window_params = [{pipeline_mode = #tpu.pipeline_mode<synchronous>, transform_indices = @transform_0, window_bounds = array<i64: 64, 128>}, {transform_indices = @transform_1, window_bounds = array<i64: 4, 2, 128>}]} {
    %c4_i32 = arith.constant 4 : i32
    %0 = arith.muli %arg0, %c4_i32 : i32
    %c0_i32 = arith.constant 0 : i32
    %1 = arith.addi %0, %c0_i32 : i32
    %c2_i32 = arith.constant 2 : i32
    %2 = arith.muli %1, %c2_i32 : i32
    %c0_i32_0 = arith.constant 0 : i32
    %3 = arith.addi %2, %c0_i32_0 : i32
    %4 = arith.index_cast %3 : i32 to index
    %5 = memref.load %arg1[%4] : memref<16xi32, #tpu.memory_space<smem>>
    %c0_i32_1 = arith.constant 0 : i32
    %c63_i32 = arith.constant 63 : i32
    %6 = arith.maxsi %c0_i32_1, %5 : i32
    %7 = arith.minsi %c63_i32, %6 : i32
    %8 = arith.index_cast %7 : i32 to index
    %c0 = arith.constant 0 : index
    %9 = vector.load %arg2[%8, %c0] : memref<64x128xf32, #tpu.memory_space<vmem>>, vector<1x128xf32>
    %c0_2 = arith.constant 0 : index
    %c0_3 = arith.constant 0 : index
    %c0_4 = arith.constant 0 : index
    %10 = vector.load %arg3[%c0_2, %c0_3, %c0_4] : memref<4x2x128xf32, #tpu.memory_space<vmem>>, vector<1x1x128xf32>
    %11 = vector.shape_cast %10 : vector<1x1x128xf32> to vector<1x128xf32>
    %12 = vector.shape_cast %9 : vector<1x128xf32> to vector<1x1x128xf32>
    tpu.vector_store %arg3[%c0_2, %c0_3, %c0_4], %12 {strides = array<i32>} : memref<4x2x128xf32, #tpu.memory_space<vmem>>, vector<1x1x128xf32>,
    %c0_i32_5 = arith.constant 0 : i32
    %13 = arith.addi %0, %c0_i32_5 : i32
    %c2_i32_6 = arith.constant 2 : i32
    %14 = arith.muli %13, %c2_i32_6 : i32
    %c1_i32 = arith.constant 1 : i32
    %15 = arith.addi %14, %c1_i32 : i32
    %16 = arith.index_cast %15 : i32 to index
    %17 = memref.load %arg1[%16] : memref<16xi32, #tpu.memory_space<smem>>
    %c0_i32_7 = arith.constant 0 : i32
    %c63_i32_8 = arith.constant 63 : i32
    %18 = arith.maxsi %c0_i32_7, %17 : i32
    %19 = arith.minsi %c63_i32_8, %18 : i32
    %20 = arith.index_cast %19 : i32 to index
    %c0_9 = arith.constant 0 : index
    %21 = vector.load %arg2[%20, %c0_9] : memref<64x128xf32, #tpu.memory_space<vmem>>, vector<1x128xf32>
    %c0_10 = arith.constant 0 : index
    %c1 = arith.constant 1 : index
    %c0_11 = arith.constant 0 : index
    %22 = vector.load %arg3[%c0_10, %c1, %c0_11] : memref<4x2x128xf32, #tpu.memory_space<vmem>>, vector<1x1x128xf32>
    %23 = vector.shape_cast %22 : vector<1x1x128xf32> to vector<1x128xf32>
    %24 = vector.shape_cast %21 : vector<1x128xf32> to vector<1x1x128xf32>
    tpu.vector_store %arg3[%c0_10, %c1, %c0_11], %24 {strides = array<i32>} : memref<4x2x128xf32, #tpu.memory_space<vmem>>, vector<1x1x128xf32>,
    %c1_i32_12 = arith.constant 1 : i32
    %25 = arith.addi %0, %c1_i32_12 : i32
    %c2_i32_13 = arith.constant 2 : i32
    %26 = arith.muli %25, %c2_i32_13 : i32
    %c0_i32_14 = arith.constant 0 : i32
    %27 = arith.addi %26, %c0_i32_14 : i32
    %28 = arith.index_cast %27 : i32 to index
    %29 = memref.load %arg1[%28] : memref<16xi32, #tpu.memory_space<smem>>
    %c0_i32_15 = arith.constant 0 : i32
    %c63_i32_16 = arith.constant 63 : i32
    %30 = arith.maxsi %c0_i32_15, %29 : i32
    %31 = arith.minsi %c63_i32_16, %30 : i32
    %32 = arith.index_cast %31 : i32 to index
    %c0_17 = arith.constant 0 : index
    %33 = vector.load %arg2[%32, %c0_17] : memref<64x128xf32, #tpu.memory_space<vmem>>, vector<1x128xf32>
    %c1_18 = arith.constant 1 : index
    %c0_19 = arith.constant 0 : index
    %c0_20 = arith.constant 0 : index
    %34 = vector.load %arg3[%c1_18, %c0_19, %c0_20] : memref<4x2x128xf32, #tpu.memory_space<vmem>>, vector<1x1x128xf32>
    %35 = vector.shape_cast %34 : vector<1x1x128xf32> to vector<1x128xf32>
    %36 = vector.shape_cast %33 : vector<1x128xf32> to vector<1x1x128xf32>
    tpu.vector_store %arg3[%c1_18, %c0_19, %c0_20], %36 {strides = array<i32>} : memref<4x2x128xf32, #tpu.memory_space<vmem>>, vector<1x1x128xf32>,
    %c1_i32_21 = arith.constant 1 : i32
    %37 = arith.addi %0, %c1_i32_21 : i32
    %c2_i32_22 = arith.constant 2 : i32
    %38 = arith.muli %37, %c2_i32_22 : i32
    %c1_i32_23 = arith.constant 1 : i32
    %39 = arith.addi %38, %c1_i32_23 : i32
    %40 = arith.index_cast %39 : i32 to index
    %41 = memref.load %arg1[%40] : memref<16xi32, #tpu.memory_space<smem>>
    %c0_i32_24 = arith.constant 0 : i32
    %c63_i32_25 = arith.constant 63 : i32
    %42 = arith.maxsi %c0_i32_24, %41 : i32
    %43 = arith.minsi %c63_i32_25, %42 : i32
    %44 = arith.index_cast %43 : i32 to index
    %c0_26 = arith.constant 0 : index
    %45 = vector.load %arg2[%44, %c0_26] : memref<64x128xf32, #tpu.memory_space<vmem>>, vector<1x128xf32>
    %c1_27 = arith.constant 1 : index
    %c1_28 = arith.constant 1 : index
    %c0_29 = arith.constant 0 : index
    %46 = vector.load %arg3[%c1_27, %c1_28, %c0_29] : memref<4x2x128xf32, #tpu.memory_space<vmem>>, vector<1x1x128xf32>
    %47 = vector.shape_cast %46 : vector<1x1x128xf32> to vector<1x128xf32>
    %48 = vector.shape_cast %45 : vector<1x128xf32> to vector<1x1x128xf32>
    tpu.vector_store %arg3[%c1_27, %c1_28, %c0_29], %48 {strides = array<i32>} : memref<4x2x128xf32, #tpu.memory_space<vmem>>, vector<1x1x128xf32>,
    %c2_i32_30 = arith.constant 2 : i32
    %49 = arith.addi %0, %c2_i32_30 : i32
    %c2_i32_31 = arith.constant 2 : i32
    %50 = arith.muli %49, %c2_i32_31 : i32
    %c0_i32_32 = arith.constant 0 : i32
    %51 = arith.addi %50, %c0_i32_32 : i32
    %52 = arith.index_cast %51 : i32 to index
    %53 = memref.load %arg1[%52] : memref<16xi32, #tpu.memory_space<smem>>
    %c0_i32_33 = arith.constant 0 : i32
    %c63_i32_34 = arith.constant 63 : i32
    %54 = arith.maxsi %c0_i32_33, %53 : i32
    %55 = arith.minsi %c63_i32_34, %54 : i32
    %56 = arith.index_cast %55 : i32 to index
    %c0_35 = arith.constant 0 : index
    %57 = vector.load %arg2[%56, %c0_35] : memref<64x128xf32, #tpu.memory_space<vmem>>, vector<1x128xf32>
    %c2 = arith.constant 2 : index
    %c0_36 = arith.constant 0 : index
    %c0_37 = arith.constant 0 : index
    %58 = vector.load %arg3[%c2, %c0_36, %c0_37] : memref<4x2x128xf32, #tpu.memory_space<vmem>>, vector<1x1x128xf32>
    %59 = vector.shape_cast %58 : vector<1x1x128xf32> to vector<1x128xf32>
    %60 = vector.shape_cast %57 : vector<1x128xf32> to vector<1x1x128xf32>
    tpu.vector_store %arg3[%c2, %c0_36, %c0_37], %60 {strides = array<i32>} : memref<4x2x128xf32, #tpu.memory_space<vmem>>, vector<1x1x128xf32>,
    %c2_i32_38 = arith.constant 2 : i32
    %61 = arith.addi %0, %c2_i32_38 : i32
    %c2_i32_39 = arith.constant 2 : i32
    %62 = arith.muli %61, %c2_i32_39 : i32
    %c1_i32_40 = arith.constant 1 : i32
    %63 = arith.addi %62, %c1_i32_40 : i32
    %64 = arith.index_cast %63 : i32 to index
    %65 = memref.load %arg1[%64] : memref<16xi32, #tpu.memory_space<smem>>
    %c0_i32_41 = arith.constant 0 : i32
    %c63_i32_42 = arith.constant 63 : i32
    %66 = arith.maxsi %c0_i32_41, %65 : i32
    %67 = arith.minsi %c63_i32_42, %66 : i32
    %68 = arith.index_cast %67 : i32 to index
    %c0_43 = arith.constant 0 : index
    %69 = vector.load %arg2[%68, %c0_43] : memref<64x128xf32, #tpu.memory_space<vmem>>, vector<1x128xf32>
    %c2_44 = arith.constant 2 : index
    %c1_45 = arith.constant 1 : index
    %c0_46 = arith.constant 0 : index
    %70 = vector.load %arg3[%c2_44, %c1_45, %c0_46] : memref<4x2x128xf32, #tpu.memory_space<vmem>>, vector<1x1x128xf32>
    %71 = vector.shape_cast %70 : vector<1x1x128xf32> to vector<1x128xf32>
    %72 = vector.shape_cast %69 : vector<1x128xf32> to vector<1x1x128xf32>
    tpu.vector_store %arg3[%c2_44, %c1_45, %c0_46], %72 {strides = array<i32>} : memref<4x2x128xf32, #tpu.memory_space<vmem>>, vector<1x1x128xf32>,
    %c3_i32 = arith.constant 3 : i32
    %73 = arith.addi %0, %c3_i32 : i32
    %c2_i32_47 = arith.constant 2 : i32
    %74 = arith.muli %73, %c2_i32_47 : i32
    %c0_i32_48 = arith.constant 0 : i32
    %75 = arith.addi %74, %c0_i32_48 : i32
    %76 = arith.index_cast %75 : i32 to index
    %77 = memref.load %arg1[%76] : memref<16xi32, #tpu.memory_space<smem>>
    %c0_i32_49 = arith.constant 0 : i32
    %c63_i32_50 = arith.constant 63 : i32
    %78 = arith.maxsi %c0_i32_49, %77 : i32
    %79 = arith.minsi %c63_i32_50, %78 : i32
    %80 = arith.index_cast %79 : i32 to index
    %c0_51 = arith.constant 0 : index
    %81 = vector.load %arg2[%80, %c0_51] : memref<64x128xf32, #tpu.memory_space<vmem>>, vector<1x128xf32>
    %c3 = arith.constant 3 : index
    %c0_52 = arith.constant 0 : index
    %c0_53 = arith.constant 0 : index
    %82 = vector.load %arg3[%c3, %c0_52, %c0_53] : memref<4x2x128xf32, #tpu.memory_space<vmem>>, vector<1x1x128xf32>
    %83 = vector.shape_cast %82 : vector<1x1x128xf32> to vector<1x128xf32>
    %84 = vector.shape_cast %81 : vector<1x128xf32> to vector<1x1x128xf32>
    tpu.vector_store %arg3[%c3, %c0_52, %c0_53], %84 {strides = array<i32>} : memref<4x2x128xf32, #tpu.memory_space<vmem>>, vector<1x1x128xf32>,
    %c3_i32_54 = arith.constant 3 : i32
    %85 = arith.addi %0, %c3_i32_54 : i32
    %c2_i32_55 = arith.constant 2 : i32
    %86 = arith.muli %85, %c2_i32_55 : i32
    %c1_i32_56 = arith.constant 1 : i32
    %87 = arith.addi %86, %c1_i32_56 : i32
    %88 = arith.index_cast %87 : i32 to index
    %89 = memref.load %arg1[%88] : memref<16xi32, #tpu.memory_space<smem>>
    %c0_i32_57 = arith.constant 0 : i32
    %c63_i32_58 = arith.constant 63 : i32
    %90 = arith.maxsi %c0_i32_57, %89 : i32
    %91 = arith.minsi %c63_i32_58, %90 : i32
    %92 = arith.index_cast %91 : i32 to index
    %c0_59 = arith.constant 0 : index
    %93 = vector.load %arg2[%92, %c0_59] : memref<64x128xf32, #tpu.memory_space<vmem>>, vector<1x128xf32>
    %c3_60 = arith.constant 3 : index
    %c1_61 = arith.constant 1 : index
    %c0_62 = arith.constant 0 : index
    %94 = vector.load %arg3[%c3_60, %c1_61, %c0_62] : memref<4x2x128xf32, #tpu.memory_space<vmem>>, vector<1x1x128xf32>
    %95 = vector.shape_cast %94 : vector<1x1x128xf32> to vector<1x128xf32>
    %96 = vector.shape_cast %93 : vector<1x128xf32> to vector<1x1x128xf32>
    tpu.vector_store %arg3[%c3_60, %c1_61, %c0_62], %96 {strides = array<i32>} : memref<4x2x128xf32, #tpu.memory_space<vmem>>, vector<1x1x128xf32>,
    return
  }
  func.func @transform_0(%arg0: i32, %arg1: memref<16xi32, #tpu.memory_space<smem>>) -> (i32, i32) {
    %c0_i32 = arith.constant 0 : i32
    %c0_i32_0 = arith.constant 0 : i32
    %c0_i32_1 = arith.constant 0 : i32
    return %c0_i32, %c0_i32_0 : i32, i32
  }
  func.func @transform_1(%arg0: i32, %arg1: memref<16xi32, #tpu.memory_space<smem>>) -> (i32, i32, i32) {
    %c0_i32 = arith.constant 0 : i32
    %c0_i32_0 = arith.constant 0 : i32
    %c0_i32_1 = arith.constant 0 : i32
    return %arg0, %c0_i32, %c0_i32_0 : i32, i32, i32
  }
}

</mosaic_0001>

<bundles_post_ra>
// kernel: tpu_custom_call.1
= control target key start
LH: loop header
LB: loop body
LE: loop exit
PB: predicated region body
PF: predicated region fallthrough
CT: control target
= control target key end

     0   :  { %s524_s9 = smov [#allocation3]   ;;  %s687_s0 = inlined_call_operand.hbm [shape: s32[16], index: 0, kind: input, shape index: {}]   ;;  %s688_s1 = inlined_call_operand.hbm [shape: f32[64,128], index: 1, kind: input, shape index: {}]   ;;  %s689_s2 = inlined_call_operand.hbm [shape: f32[8,2,128], index: 2, kind: output, shape index: {}]  }
   0x1   :  { %8 = dma.hbm_to_smem %s687_s0, 16, %s524_s9, [#allocation2] }
   0x2   :  { %498 = dma.done.wait [#allocation2], 16 }
   0x3   :  { %499 = vsyncadd [#allocation2], 4294967280 }
   0x4   :  { %10 = sfence }
   0x5   :  { %11 = vsyncpa [#allocation5], 0 }
   0x6   :  { %12 = vsyncpa [#allocation6], 0 }
   0x7   :  { %14 = vsyncpa [#allocation6 + $0x1], 0  ;;  %s549_s12 = smov 0   ;;  %s551_s13 = smov 0  }
   0x8   :  { %s553_s14 = smov 0   ;;  %s555_s15 = smov 0  }
   0x9 LB: > { %s570_s0 = sadd.s32 4294967295, %s522_s15   ;;  %s279_s16 = sadd.s32 4294967294, %s522_s15   ;;  %s522_s15 = sphi %s555_s15, %s697_s15   ;;  %s518_s14 = sphi %s553_s14, %s696_s14   ;;  %s514_s13 = sphi %s551_s13, %s695_s13   ;;  %s510_s12 = sphi %s549_s12, %s694_s12  }
   0xa   : > { %s574_s17 = sadd.s32 1, %s522_s15   ;;  %s48_s18 = sadd.s32 1, %s518_s14 }
   0xb   : > { %s45_s19 = ssub.s32 %s522_s15, %s574_s17  ;;  %p58_p0 = scmp.ne.s32.totalorder %s518_s14, %s514_s13 }
   0xc   : > { %p46_p1 = scmp.eq.s32.totalorder %s45_s19, 0  ;;  %p59_p2 = scmp.eq.s32.totalorder %s570_s0, 1 }
   0xd   : > { %p64_p3 = scmp.ne.s32.totalorder %s514_s13, %s510_s12  ;;  %p65_p4 = scmp.eq.s32.totalorder %s279_s16, 1 }
   0xe   : > { %s585_s20 = scalar_select %p46_p1, %s518_s14, %s48_s18  }
   0xf   : > { %p587_p5 = por %p59_p2, %p58_p0  ;;  %p591_p6 = por %p65_p4, %p64_p3 }
  0x10   : > { %p280_p7 = scmp.ge.s32.totalorder %s522_s15, 1  ;;  %p72_p8 = scmp.lt.s32.totalorder %s522_s15, 3 }
  0x11   : > { %s691_s22 = scalar_select %p591_p6, 1, 0 }
  0x12   : > { %p381_p9 = scmp.eq.s32.totalorder %s570_s0, 0  ;;  %p598_p10 = pnand %p280_p7, %p72_p8 }
  0x13   : > { %s525_s24 = smov [#allocation4]  }
  0x14   : > { %s84_s25 = sshll.u32 %s525_s24, 4  ;;  %p373_p11 = pneg %p598_p10  ;;  %s85_s25 = int_to_ptr.vmem [resolvable:$true] %s84_s25 }
  0x15   : > { %s441_s26 = scalar_lea.vmem %s85_s25, 1024  ;;  %p449_p3 = scmp.lt.s32.totalorder %s85_s25, %s85_s25 }
  0x16   : > { %p374_p12 = pnand %p381_p9, %p373_p11  ;;  %p442_p0 = scmp.ne.s32.totalorder %s85_s25, %s441_s26 }
  0x17   : > { %p450_p4 = scmp.lt.s32.totalorder %s441_s26, %s441_s26 }
  0x18   : > { %p432_p13 = pneg %p374_p12 }
  0x19   : > { %p451_p6 = por %p450_p4, %p449_p3 }
  0x1a   : > { %p444_p1 = pnand %p442_p0, %p432_p13 }
  0x1c   : > { %p445_p2 = pneg %p444_p1 }
  0x1e   : > { %p452_p7 = pnand %p451_p6, %p445_p2 }
  0x20   : > { %455 = shalt.err (!%p452_p7)
}
  0x21   : > { %s526_s27 = smov 128   ;;  %s527_s28 = smov 8  }
  0x22   : > { %376 = dma.hbm_to_vmem [thread:$0]  (!%p374_p12), %s688_s1, 1024, %s85_s25, [#allocation5], %s526_s27, %s526_s27, %s527_s28  }
  0x23   : > { %100 = sbr.rel (%p598_p10) target bundleno = 96 (0x60), region = 24 }
  0x28   : > { %501 = dma.done.wait (%p381_p9), [#allocation5], 1024  }
  0x29   : > { %503 = vsyncadd (%p381_p9), [#allocation5], 4294966272  ;;  %s112_s3 = sand.u32 1, %s514_s13   ;;  %s617_s4 = sshll.u32 %s570_s0, 3 }
  0x2a   : > { %s284_s5 = sshll.u32 %s112_s3, 3  ;;  %s118_s6 = sld [smem:[#allocation3 + %s617_s4]] }
  0x2b   : > { %s126_s7 = sadd.s32 1, %s617_s4  ;;  %s346_s9 = sadd.s32 2, %s617_s4 }
  0x2c   : > { %s127_s8 = sld [smem:[#allocation3 + %s126_s7]]  ;;  %s352_s10 = sadd.s32 4, %s617_s4 }
  0x2d   : > { %s137_s11 = sld [smem:[#allocation3 + %s346_s9]]  ;;  %s146_s16 = sadd.s32 1, %s346_s9 }
  0x2e   : > { %s147_s18 = sld [smem:[#allocation3 + %s146_s16]]  ;;  %s166_s19 = sadd.s32 1, %s352_s10 }
  0x2f   : > { %s625_s24 = scalar_lea.vmem [#allocation7], %s284_s5  ;;  %s157_s27 = sld [smem:[#allocation3 + %s352_s10]] }
  0x30   : > { %p119_p6 = scmp.gt.s32.totalorder %s118_s6, 0  ;;  %p287_p8 = scmp.lt.s32.totalorder %s118_s6, 63 }
  0x31   : > { %s167_s29 = sld [smem:[#allocation3 + %s166_s19]]  ;;  %s358_s30 = sadd.s32 6, %s617_s4 }
  0x32   : > { %s699_s6 = smov (!%p119_p6, %s118_s6), 0  ;;  %p128_p9 = scmp.gt.s32.totalorder %s127_s8, 0 }
  0x33   : > { %p292_p10 = scmp.lt.s32.totalorder %s127_s8, 63  ;;  %s701_s6 = smov (!%p287_p8, %s699_s6), 63 }
  0x34   : > { %s703_s8 = smov (!%p128_p9, %s127_s8), 0  ;;  %p138_p11 = scmp.gt.s32.totalorder %s137_s11, 0 }
  0x35   : > { %s123_s23 = scalar_lea.vmem [#allocation4], %s701_s6  ;;  %s705_s8 = smov (!%p292_p10, %s703_s8), 63 }
  0x36   : > { %v124_v0 = vld [vmem:[%s123_s23] sm:$0x1]  ;;  %s139_s25 = scalar_select %p138_p11, %s137_s11, 0 }
  0x37   : > { %125 = vst [vmem:[%s625_s24] sm:$0x1] %v124_v0  ;;  %p298_p12 = scmp.lt.s32.totalorder %s137_s11, 63  ;;  %s132_s26 = scalar_lea.vmem [#allocation4], %s705_s8 }
  0x38   : > { %v133_v1 = vld [vmem:[%s132_s26] sm:$0x1]  ;;  %p148_p13 = scmp.gt.s32.totalorder %s147_s18, 0  ;;  %p304_p0 = scmp.lt.s32.totalorder %s147_s18, 63 }
  0x39   : > { %134 = vst [vmem:[%s625_s24 + $0x1] sm:$0x1] %v133_v1  ;;  %s707_s25 = smov (!%p298_p12, %s139_s25), 63  ;;  %s177_s6 = sld [smem:[#allocation3 + %s358_s30]] }
  0x3a   : > { %s709_s18 = smov (!%p148_p13, %s147_s18), 0  ;;  %s142_s28 = scalar_lea.vmem [#allocation4], %s707_s25 }
  0x3b   : > { %v143_v2 = vld [vmem:[%s142_s28] sm:$0x1]  ;;  %s711_s18 = smov (!%p304_p0, %s709_s18), 63  ;;  %s186_s7 = sadd.s32 1, %s358_s30 }
  0x3c   : > { %303 = vst [vmem:[%s625_s24 + $0x2] sm:$0x1] %v143_v2  ;;  %s152_s5 = scalar_lea.vmem [#allocation4], %s711_s18  ;;  %s209_s8 = sshll.u32 %s625_s24, 4  ;;  %s636_s8 = int_to_ptr.vmem [resolvable:$true] %s209_s8 }
  0x3d   : > { %v153_v3 = vld [vmem:[%s152_s5] sm:$0x1]  ;;  %p158_p1 = scmp.gt.s32.totalorder %s157_s27, 0  ;;  %p311_p2 = scmp.lt.s32.totalorder %s157_s27, 63 }
  0x3e   : > { %309 = vst [vmem:[%s625_s24 + $0x3] sm:$0x1] %v153_v3  ;;  %s187_s9 = sld [smem:[#allocation3 + %s186_s7]]  ;;  %s363_s11 = sshll.u32 %s570_s0, 7 }
  0x3f   : > { %s713_s27 = smov (!%p158_p1, %s157_s27), 0  ;;  %p168_p3 = scmp.gt.s32.totalorder %s167_s29, 0 }
  0x40   : > { %p317_p4 = scmp.lt.s32.totalorder %s167_s29, 63  ;;  %s715_s27 = smov (!%p311_p2, %s713_s27), 63 }
  0x41   : > { %s717_s29 = smov (!%p168_p3, %s167_s29), 0  ;;  %p178_p7 = scmp.gt.s32.totalorder %s177_s6, 0 }
  0x42   : > { %s162_s10 = scalar_lea.vmem [#allocation4], %s715_s27  ;;  %s719_s29 = smov (!%p317_p4, %s717_s29), 63 }
  0x43   : > { %v163_v4 = vld [vmem:[%s162_s10] sm:$0x1]  ;;  %s179_s4 = scalar_select %p178_p7, %s177_s6, 0 }
  0x44   : > { %316 = vst [vmem:[%s625_s24 + $0x4] sm:$0x1] %v163_v4  ;;  %p324_p6 = scmp.lt.s32.totalorder %s177_s6, 63  ;;  %s172_s16 = scalar_lea.vmem [#allocation4], %s719_s29 }
  0x45   : > { %v173_v5 = vld [vmem:[%s172_s16] sm:$0x1]  ;;  %p188_p8 = scmp.gt.s32.totalorder %s187_s9, 0  ;;  %p330_p9 = scmp.lt.s32.totalorder %s187_s9, 63 }
  0x46   : > { %322 = vst [vmem:[%s625_s24 + $0x5] sm:$0x1] %v173_v5  ;;  %s721_s4 = smov (!%p324_p6, %s179_s4), 63  ;;  %s642_s23 = scalar_lea.hbm %s689_s2, %s363_s11 }
  0x47   : > { %s723_s9 = smov (!%p188_p8, %s187_s9), 0  ;;  %s182_s0 = scalar_lea.vmem [#allocation4], %s721_s4 }
  0x48   : > { %v183_v6 = vld [vmem:[%s182_s0] sm:$0x1]  ;;  %s725_s9 = smov (!%p330_p9, %s723_s9), 63  ;;  %s647_s26 = scalar_lea.sflag [#allocation6], %s112_s3 }
  0x49   : > { %329 = vst [vmem:[%s625_s24 + $0x6] sm:$0x1] %v183_v6  ;;  %s192_s25 = scalar_lea.vmem [#allocation4], %s725_s9  ;;  %s456_s27 = scalar_lea.vmem %s636_s8, 128 }
  0x4a   : > { %v193_v7 = vld [vmem:[%s192_s25] sm:$0x1]  ;;  %p457_p10 = scmp.ne.s32.totalorder %s636_s8, %s456_s27  ;;  %s528_s28 = smov [#allocation7]  }
  0x4b   : > { %335 = vst [vmem:[%s625_s24 + $0x7] sm:$0x1] %v193_v7  ;;  %s460_s29 = sshll.u32 %s528_s28, 4  ;;  %s461_s29 = int_to_ptr.vmem [resolvable:$false] %s460_s29 }
  0x4c   : > { %p458_p11 = pnand %p457_p10, %p587_p5  ;;  %s462_s30 = scalar_lea.vmem %s461_s29, 256 }
  0x4d   : > { %p463_p13 = scmp.lt.s32.totalorder %s636_s8, %s461_s29  ;;  %p464_p0 = scmp.lt.s32.totalorder %s462_s30, %s456_s27 }
  0x4e   : > { %p459_p12 = pneg %p458_p11 }
  0x4f   : > { %p465_p1 = por %p464_p0, %p463_p13 }
  0x51   : > { %p466_p2 = pnand %p465_p1, %p459_p12 }
  0x53   : > { %469 = shalt.err (!%p466_p2)
}
  0x54   : > { %s470_s3 = scalar_lea.hbm %s642_s23, 128  ;;  %s474_s6 = scalar_lea.hbm %s689_s2, 256 }
  0x55   : > { %p471_p3 = scmp.ne.s32.totalorder %s642_s23, %s470_s3  ;;  %p475_p6 = scmp.lt.s32.totalorder %s642_s23, %s689_s2 }
  0x56   : > { %p476_p8 = scmp.lt.s32.totalorder %s474_s6, %s470_s3 }
  0x57   : > { %p472_p4 = pnand %p471_p3, %p587_p5 }
  0x58   : > { %p477_p9 = por %p476_p8, %p475_p6 }
  0x59   : > { %p473_p7 = pneg %p472_p4 }
  0x5b   : > { %p478_p10 = pnand %p477_p9, %p473_p7 }
  0x5d   : > { %481 = shalt.err (!%p478_p10)
}
  0x5e   : > { %s529_s11 = smov 32   ;;  %s530_s10 = smov 2  }
  0x5f   : > { %371 = dma.vmem_to_hbm [thread:$0]  (%p587_p5), %s636_s8, 128, %s642_s23, %s647_s26, %s529_s11, %s529_s11, %s530_s10  }
  0x60 PF: > { %p383_p11 = scmp.ge.s32.totalorder %s522_s15, 2  ;;  %s224_s4 = sand.u32 1, %s510_s12  }
  0x61   : > { %p693_p12 = scmp.ne.s32.totalorder %s691_s22, 0  ;;  %s225_s16 = scalar_lea.sflag [#allocation6], %s224_s4 }
  0x63   : > { %p378_p13 = pnand %p383_p11, %p693_p12 }
  0x65   : > { %p379_p0 = pneg %p378_p13 }
  0x67   : > { %505 = dma.done.wait (%p379_p0), %s225_s16, 128  }
  0x68   : > { %507 = vsyncadd (%p379_p0), %s225_s16, 4294967168  ;;  %p17_p1 = scmp.ge.s32.totalorder %s574_s17, 4   ;;  %s694_s12 = smov %s514_s13 }
  0x69   : > { %s695_s13 = smov %s518_s14  ;;  %s696_s14 = smov %s585_s20 }
  0x6a   : > { %s697_s15 = smov %s574_s17  ;;  %19 = sbr.rel (!%p17_p1) target bundleno = 9 (0x9), region = 72 }
  0x6f   :  { %230 = vsyncpa [#allocation5], 1 }
  0x70   :  { %232 = vsyncpa [#allocation5 + $0x1], 1 }
  0x71   :  { %233 = vsyncpa [#allocation6], 1 }
  0x72   :  { %235 = vsyncpa [#allocation6 + $0x1], 1 }

</bundles_post_ra>
